<compile_context>
chip_gen: v5e
topology: v5e:2x2
jax: 0.10.0
libtpu: 0.0.40
codegen_flags: <defaults>
</compile_context>

<pallas_src>
import functools

import numpy as np
import jax
import jax.numpy as jnp
from jax.experimental import pallas as pl
from jax.experimental.pallas import tpu as pltpu


def _cc_kernel(left_ref, right_ref, wl_ref, bl_ref, wrp_ref, brp_ref,
               wc0_ref, wc1_ref, wc2_ref, mask_ref, out_ref, *, L):
    """One lane block.

    left_ref / right_ref : (L, N)   channels x lanes (lane = t, or b*T + t)
    wl_ref               : (L, L)   left Linear weight
    bl_ref               : (L, 1)   left Linear bias
    wrp_ref              : (2L, L)  [row-reversed right Linear weight ; zeros]
    brp_ref              : (2L, 1)  [row-reversed right Linear bias   ; zeros]
    wc{0,1,2}_ref        : (L, 2L)  Conv1d tap k = 0, 1, 2 weights
    mask_ref             : (2, N)   row0: 0. where t==0, row1: 0. where t==T-1
    out_ref              : (L, N)
    """
    N = out_ref.shape[-1]

    # --- 1. channel-mixing Linear(L, L); bias added in-kernel ---------------
    l2 = jnp.dot(wl_ref[...], left_ref[...],
                 preferred_element_type=jnp.float32) + bl_ref[...]
    # rows 0..L-1 = reversed right activations, rows L..2L-1 = 0 (the weight
    # rows are pre-zeroed, so no in-kernel concat / iota mask is needed).
    r = jnp.dot(wrp_ref[...], right_ref[...],
                preferred_element_type=jnp.float32) + brp_ref[...]

    # --- 2. channel-axis cross-correlation: incremental roll + FMA ----------
    # corr[i, :] = sum_j l2[j, :] * r2_rev[i - j, :]   (zero outside range)
    corr = l2[0:1, :] * r
    for j in range(1, L):
        r = pltpu.roll(r, 1, axis=0)
        corr = corr + l2[j:j + 1, :] * r

    # --- 3. Conv1d(2L->L, k=3, pad=1, no bias): 3 matmuls + shift/mask ------
    y0 = jnp.dot(wc0_ref[...], corr, preferred_element_type=jnp.float32)
    y1 = jnp.dot(wc1_ref[...], corr, preferred_element_type=jnp.float32)
    y2 = jnp.dot(wc2_ref[...], corr, preferred_element_type=jnp.float32)

    not_first = mask_ref[0:1, :]   # kills t-1 tap at t == 0 (and batch seams)
    not_last = mask_ref[1:2, :]    # kills t+1 tap at t == T-1
    out_ref[...] = (y1
                    + not_first * pltpu.roll(y0, 1, axis=1)
                    + not_last * pltpu.roll(y2, N - 1, axis=1))


def _prep_params(wl, bl, wr, br, wconv, L):
    f32 = jnp.float32
    wl_f = wl.astype(f32)
    bl_f = bl.astype(f32).reshape(L, 1)
    wrp = jnp.concatenate([wr.astype(f32)[::-1, :],
                           jnp.zeros((L, L), f32)], axis=0)            # (2L, L)
    brp = jnp.concatenate([br.astype(f32)[::-1].reshape(L, 1),
                           jnp.zeros((L, 1), f32)], axis=0)            # (2L, 1)
    wc0 = wconv[:, :, 0].astype(f32)                                   # (L, 2L)
    wc1 = wconv[:, :, 1].astype(f32)
    wc2 = wconv[:, :, 2].astype(f32)
    return wl_f, bl_f, wrp, brp, wc0, wc1, wc2


def _param_specs(L):
    c = lambda b: (0, 0)
    return [
        pl.BlockSpec((L, L), c),           # wl
        pl.BlockSpec((L, 1), c),           # bl
        pl.BlockSpec((2 * L, L), c),       # wrp
        pl.BlockSpec((2 * L, 1), c),       # brp
        pl.BlockSpec((L, 2 * L), c),       # wc0
        pl.BlockSpec((L, 2 * L), c),       # wc1
        pl.BlockSpec((L, 2 * L), c),       # wc2
    ]


def _time_mask(T, N):
    t = jnp.arange(N, dtype=jnp.int32) % T
    return jnp.stack([(t != 0), (t != T - 1)]).astype(jnp.float32)     # (2, N)


def _compiler_params():
    # Explicit vmem limit (>= the 16 MiB default on v5e, <= physical on v7x).
    return pltpu.CompilerParams(dimension_semantics=("parallel",),
                                vmem_limit_bytes=32 * 1024 * 1024)


def _pick_batch_block(B, T, min_lanes=512, max_lanes=1024):
    """Batch rows folded per block for the lane-folded (small-T) path.

    Prefers 512-1024 lane blocks (multiple of 128) so live (2L, N) arrays fit
    the vreg file and nb >= 2 blocks can shard across v7x's two TensorCores;
    falls back to the whole batch (block == full array) if no valid folding.
    """
    valid = [bb for bb in range(1, B + 1)
             if B % bb == 0 and (bb * T) % 128 == 0 and bb * T <= max_lanes]
    if valid:
        preferred = [bb for bb in valid if bb * T >= min_lanes]
        return min(preferred) if preferred else max(valid)
    return B


def _run_natural(left, right, params, L, B, T, kernel):
    """Natural [B, L, T] blocking (T multiple of 128): no wrapper transposes."""
    mask = _time_mask(T, T)
    io_spec = pl.BlockSpec((None, L, T), lambda b: (b, 0, 0))
    grid_spec = pltpu.PrefetchScalarGridSpec(
        num_scalar_prefetch=0,
        grid=(B,),
        in_specs=[io_spec, io_spec] + _param_specs(L)
                 + [pl.BlockSpec((2, T), lambda b: (0, 0))],
        out_specs=pl.BlockSpec((None, L, T), lambda b: (b, 0, 0)),
    )
    return pl.pallas_call(
        kernel,
        out_shape=jax.ShapeDtypeStruct((B, L, T), jnp.float32),
        grid_spec=grid_spec,
        compiler_params=_compiler_params(),
    )(left.astype(jnp.float32), right.astype(jnp.float32), *params, mask)


def _run_folded(left, right, params, L, B, T, kernel):
    """Small / ragged T: fold batch into the lane axis for lane-dense blocks."""
    bb = _pick_batch_block(B, T)
    nb = B // bb
    BTb = bb * T
    f32 = jnp.float32
    # [B, L, T] -> [L, B*T]  (column index = b*T + t)
    left2 = jnp.transpose(left, (1, 0, 2)).reshape(L, B * T).astype(f32)
    right2 = jnp.transpose(right, (1, 0, 2)).reshape(L, B * T).astype(f32)
    mask = _time_mask(T, BTb)        # periodic per block; also kills batch seams
    io_spec = pl.BlockSpec((L, BTb), lambda b: (0, b))
    grid_spec = pltpu.PrefetchScalarGridSpec(
        num_scalar_prefetch=0,
        grid=(nb,),
        in_specs=[io_spec, io_spec] + _param_specs(L)
                 + [pl.BlockSpec((2, BTb), lambda b: (0, 0))],
        out_specs=io_spec,
    )
    out2 = pl.pallas_call(
        kernel,
        out_shape=jax.ShapeDtypeStruct((L, B * T), f32),
        grid_spec=grid_spec,
        compiler_params=_compiler_params(),
    )(left2, right2, *params, mask)
    return jnp.transpose(out2.reshape(L, B, T), (1, 0, 2))


def cross_correlation_pallas(left, right, wl, bl, wr, br, wconv):
    """left, right: [B, L, T].  wl/wr: [L, L], bl/br: [L], wconv: [L, 2L, 3]."""
    B, L, T = left.shape
    params = _prep_params(wl, bl, wr, br, wconv, L)
    kernel = functools.partial(_cc_kernel, L=L)
    if T % 128 == 0:
        return _run_natural(left, right, params, L, B, T, kernel)
    return _run_folded(left, right, params, L, B, T, kernel)


def cross_correlation_ref(left, right, wl, bl, wr, br, wconv):
    """Pure-JAX reference mirroring the PyTorch forward exactly."""
    B, L, T = left.shape
    l2 = jnp.einsum('oc,bct->bot', wl, left) + bl[None, :, None]
    r2 = jnp.einsum('oc,bct->bot', wr, right) + br[None, :, None]
    lp = jnp.concatenate([l2, jnp.zeros_like(l2)], axis=1)        # [B, 2L, T]
    rp = jnp.concatenate([jnp.zeros_like(r2), r2], axis=1)        # [B, 2L, T]
    rows = []
    for i in range(2 * L):
        tl = lp[:, :i + 1, :]
        tr = rp[:, 2 * L - 1 - i:, :]
        rows.append(jnp.sum(tl * tr, axis=1, keepdims=True))
    corr = jnp.concatenate(rows, axis=1)                          # [B, 2L, T]
    corr_pad = jnp.pad(corr, ((0, 0), (0, 0), (1, 1)))
    out = jnp.zeros((B, L, T), jnp.float32)
    for k in range(3):
        out = out + jnp.einsum('oc,bct->bot', wconv[:, :, k],
                               corr_pad[:, :, k:k + T])
    return out


if __name__ == "__main__":
    L = 8

    key = jax.random.PRNGKey(0)
    k_data, k_wl, k_bl, k_wr, k_br, k_conv = jax.random.split(key, 6)

    # Deterministic parameters (uniform, PyTorch-like fan-in scaling).
    lin_bound = 1.0 / np.sqrt(L)
    conv_bound = 1.0 / np.sqrt(2 * L * 3)
    wl = jax.random.uniform(k_wl, (L, L), jnp.float32, -lin_bound, lin_bound)
    bl = jax.random.uniform(k_bl, (L,), jnp.float32, -lin_bound, lin_bound)
    wr = jax.random.uniform(k_wr, (L, L), jnp.float32, -lin_bound, lin_bound)
    br = jax.random.uniform(k_br, (L,), jnp.float32, -lin_bound, lin_bound)
    wconv = jax.random.uniform(k_conv, (L, 2 * L, 3), jnp.float32,
                               -conv_bound, conv_bound)

    # (B, T) = (2, 16)  exercises the lane-folded small-T path;
    # (B, T) = (2, 128) exercises the natural lane-dense [B, L, T] path.
    for (B, T) in [(2, 16), (2, 128)]:
        k_l, k_r = jax.random.split(jax.random.fold_in(k_data, T))
        left = jax.random.normal(k_l, (B, L, T), dtype=jnp.float32)
        right = jax.random.normal(k_r, (B, L, T), dtype=jnp.float32)

        out = jax.block_until_ready(
            cross_correlation_pallas(left, right, wl, bl, wr, br, wconv))
        ref = jax.block_until_ready(
            cross_correlation_ref(left, right, wl, bl, wr, br, wconv))
        np.testing.assert_allclose(np.asarray(out), np.asarray(ref),
                                   rtol=1e-4, atol=1e-4)

    print("KERNEL_OK")
</pallas_src>

<mosaic_0001>
module attributes {stable_mosaic.version = 11 : i64} {
  func.func @_cc_kernel(%arg0: i32, %arg1: memref<8x32xf32, #tpu.memory_space<vmem>>, %arg2: memref<8x32xf32, #tpu.memory_space<vmem>>, %arg3: memref<8x8xf32, #tpu.memory_space<vmem>>, %arg4: memref<8x1xf32, #tpu.memory_space<vmem>>, %arg5: memref<16x8xf32, #tpu.memory_space<vmem>>, %arg6: memref<16x1xf32, #tpu.memory_space<vmem>>, %arg7: memref<8x16xf32, #tpu.memory_space<vmem>>, %arg8: memref<8x16xf32, #tpu.memory_space<vmem>>, %arg9: memref<8x16xf32, #tpu.memory_space<vmem>>, %arg10: memref<2x32xf32, #tpu.memory_space<vmem>>, %arg11: memref<8x32xf32, #tpu.memory_space<vmem>>) attributes {dimension_semantics = [#tpu.dimension_semantics<parallel>], iteration_bounds = array<i64: 1>, scalar_prefetch = 0 : i64, scratch_operands = 0 : i64, tpu.core_type = #tpu.core_type<tc>, window_params = [{transform_indices = @transform_0, window_bounds = array<i64: 8, 32>}, {transform_indices = @transform_1, window_bounds = array<i64: 8, 32>}, {pipeline_mode = #tpu.pipeline_mode<synchronous>, transform_indices = @transform_2, window_bounds = array<i64: 8, 8>}, {pipeline_mode = #tpu.pipeline_mode<synchronous>, transform_indices = @transform_3, window_bounds = array<i64: 8, 1>}, {pipeline_mode = #tpu.pipeline_mode<synchronous>, transform_indices = @transform_4, window_bounds = array<i64: 16, 8>}, {pipeline_mode = #tpu.pipeline_mode<synchronous>, transform_indices = @transform_5, window_bounds = array<i64: 16, 1>}, {pipeline_mode = #tpu.pipeline_mode<synchronous>, transform_indices = @transform_6, window_bounds = array<i64: 8, 16>}, {pipeline_mode = #tpu.pipeline_mode<synchronous>, transform_indices = @transform_7, window_bounds = array<i64: 8, 16>}, {pipeline_mode = #tpu.pipeline_mode<synchronous>, transform_indices = @transform_8, window_bounds = array<i64: 8, 16>}, {pipeline_mode = #tpu.pipeline_mode<synchronous>, transform_indices = @transform_9, window_bounds = array<i64: 2, 32>}, {transform_indices = @transform_10, window_bounds = array<i64: 8, 32>}]} {
    %c0 = arith.constant 0 : index
    %c0_0 = arith.constant 0 : index
    %0 = vector.load %arg3[%c0, %c0_0] : memref<8x8xf32, #tpu.memory_space<vmem>>, vector<8x8xf32>
    %c0_1 = arith.constant 0 : index
    %c0_2 = arith.constant 0 : index
    %1 = vector.load %arg1[%c0_1, %c0_2] : memref<8x32xf32, #tpu.memory_space<vmem>>, vector<8x32xf32>
    %cst = arith.constant dense<0.000000e+00> : vector<8x32xf32>
    %2 = tpu.matmul %0, %1, %cst {dimension_numbers = #tpu.dot_dimension_numbers<[1], [0], [0], [1], [0, 0, 1, 1], [], []>} : vector<8x8xf32>, vector<8x32xf32>, vector<8x32xf32> -> vector<8x32xf32>
    %c0_3 = arith.constant 0 : index
    %c0_4 = arith.constant 0 : index
    %3 = vector.load %arg4[%c0_3, %c0_4] : memref<8x1xf32, #tpu.memory_space<vmem>>, vector<8x1xf32>
    %4 = vector.broadcast %3 : vector<8x1xf32> to vector<8x32xf32>
    %5 = arith.addf %2, %4 : vector<8x32xf32>
    %c0_5 = arith.constant 0 : index
    %c0_6 = arith.constant 0 : index
    %6 = vector.load %arg5[%c0_5, %c0_6] : memref<16x8xf32, #tpu.memory_space<vmem>>, vector<16x8xf32>
    %c0_7 = arith.constant 0 : index
    %c0_8 = arith.constant 0 : index
    %7 = vector.load %arg2[%c0_7, %c0_8] : memref<8x32xf32, #tpu.memory_space<vmem>>, vector<8x32xf32>
    %cst_9 = arith.constant dense<0.000000e+00> : vector<16x32xf32>
    %8 = tpu.matmul %6, %7, %cst_9 {dimension_numbers = #tpu.dot_dimension_numbers<[1], [0], [0], [1], [0, 0, 1, 1], [], []>} : vector<16x8xf32>, vector<8x32xf32>, vector<16x32xf32> -> vector<16x32xf32>
    %c0_10 = arith.constant 0 : index
    %c0_11 = arith.constant 0 : index
    %9 = vector.load %arg6[%c0_10, %c0_11] : memref<16x1xf32, #tpu.memory_space<vmem>>, vector<16x1xf32>
    %10 = vector.broadcast %9 : vector<16x1xf32> to vector<16x32xf32>
    %11 = arith.addf %8, %10 : vector<16x32xf32>
    %12 = vector.extract_strided_slice %5 {offsets = [0, 0], sizes = [1, 32], strides = [1, 1]} : vector<8x32xf32> to vector<1x32xf32>
    %13 = vector.broadcast %12 : vector<1x32xf32> to vector<16x32xf32>
    %14 = arith.mulf %13, %11 : vector<16x32xf32>
    %c1_i32 = arith.constant 1 : i32
    %15 = tpu.dynamic_rotate %11 by %c1_i32 dim 0 : vector<16x32xf32>, i32 -> vector<16x32xf32>
    %16 = vector.extract_strided_slice %5 {offsets = [1, 0], sizes = [1, 32], strides = [1, 1]} : vector<8x32xf32> to vector<1x32xf32>
    %17 = vector.broadcast %16 : vector<1x32xf32> to vector<16x32xf32>
    %18 = arith.mulf %17, %15 : vector<16x32xf32>
    %19 = arith.addf %14, %18 : vector<16x32xf32>
    %c1_i32_12 = arith.constant 1 : i32
    %20 = tpu.dynamic_rotate %15 by %c1_i32_12 dim 0 : vector<16x32xf32>, i32 -> vector<16x32xf32>
    %21 = vector.extract_strided_slice %5 {offsets = [2, 0], sizes = [1, 32], strides = [1, 1]} : vector<8x32xf32> to vector<1x32xf32>
    %22 = vector.broadcast %21 : vector<1x32xf32> to vector<16x32xf32>
    %23 = arith.mulf %22, %20 : vector<16x32xf32>
    %24 = arith.addf %19, %23 : vector<16x32xf32>
    %c1_i32_13 = arith.constant 1 : i32
    %25 = tpu.dynamic_rotate %20 by %c1_i32_13 dim 0 : vector<16x32xf32>, i32 -> vector<16x32xf32>
    %26 = vector.extract_strided_slice %5 {offsets = [3, 0], sizes = [1, 32], strides = [1, 1]} : vector<8x32xf32> to vector<1x32xf32>
    %27 = vector.broadcast %26 : vector<1x32xf32> to vector<16x32xf32>
    %28 = arith.mulf %27, %25 : vector<16x32xf32>
    %29 = arith.addf %24, %28 : vector<16x32xf32>
    %c1_i32_14 = arith.constant 1 : i32
    %30 = tpu.dynamic_rotate %25 by %c1_i32_14 dim 0 : vector<16x32xf32>, i32 -> vector<16x32xf32>
    %31 = vector.extract_strided_slice %5 {offsets = [4, 0], sizes = [1, 32], strides = [1, 1]} : vector<8x32xf32> to vector<1x32xf32>
    %32 = vector.broadcast %31 : vector<1x32xf32> to vector<16x32xf32>
    %33 = arith.mulf %32, %30 : vector<16x32xf32>
    %34 = arith.addf %29, %33 : vector<16x32xf32>
    %c1_i32_15 = arith.constant 1 : i32
    %35 = tpu.dynamic_rotate %30 by %c1_i32_15 dim 0 : vector<16x32xf32>, i32 -> vector<16x32xf32>
    %36 = vector.extract_strided_slice %5 {offsets = [5, 0], sizes = [1, 32], strides = [1, 1]} : vector<8x32xf32> to vector<1x32xf32>
    %37 = vector.broadcast %36 : vector<1x32xf32> to vector<16x32xf32>
    %38 = arith.mulf %37, %35 : vector<16x32xf32>
    %39 = arith.addf %34, %38 : vector<16x32xf32>
    %c1_i32_16 = arith.constant 1 : i32
    %40 = tpu.dynamic_rotate %35 by %c1_i32_16 dim 0 : vector<16x32xf32>, i32 -> vector<16x32xf32>
    %41 = vector.extract_strided_slice %5 {offsets = [6, 0], sizes = [1, 32], strides = [1, 1]} : vector<8x32xf32> to vector<1x32xf32>
    %42 = vector.broadcast %41 : vector<1x32xf32> to vector<16x32xf32>
    %43 = arith.mulf %42, %40 : vector<16x32xf32>
    %44 = arith.addf %39, %43 : vector<16x32xf32>
    %c1_i32_17 = arith.constant 1 : i32
    %45 = tpu.dynamic_rotate %40 by %c1_i32_17 dim 0 : vector<16x32xf32>, i32 -> vector<16x32xf32>
    %46 = vector.extract_strided_slice %5 {offsets = [7, 0], sizes = [1, 32], strides = [1, 1]} : vector<8x32xf32> to vector<1x32xf32>
    %47 = vector.broadcast %46 : vector<1x32xf32> to vector<16x32xf32>
    %48 = arith.mulf %47, %45 : vector<16x32xf32>
    %49 = arith.addf %44, %48 : vector<16x32xf32>
    %c0_18 = arith.constant 0 : index
    %c0_19 = arith.constant 0 : index
    %50 = vector.load %arg7[%c0_18, %c0_19] : memref<8x16xf32, #tpu.memory_space<vmem>>, vector<8x16xf32>
    %cst_20 = arith.constant dense<0.000000e+00> : vector<8x32xf32>
    %51 = tpu.matmul %50, %49, %cst_20 {dimension_numbers = #tpu.dot_dimension_numbers<[1], [0], [0], [1], [0, 0, 1, 1], [], []>} : vector<8x16xf32>, vector<16x32xf32>, vector<8x32xf32> -> vector<8x32xf32>
    %c0_21 = arith.constant 0 : index
    %c0_22 = arith.constant 0 : index
    %52 = vector.load %arg8[%c0_21, %c0_22] : memref<8x16xf32, #tpu.memory_space<vmem>>, vector<8x16xf32>
    %cst_23 = arith.constant dense<0.000000e+00> : vector<8x32xf32>
    %53 = tpu.matmul %52, %49, %cst_23 {dimension_numbers = #tpu.dot_dimension_numbers<[1], [0], [0], [1], [0, 0, 1, 1], [], []>} : vector<8x16xf32>, vector<16x32xf32>, vector<8x32xf32> -> vector<8x32xf32>
    %c0_24 = arith.constant 0 : index
    %c0_25 = arith.constant 0 : index
    %54 = vector.load %arg9[%c0_24, %c0_25] : memref<8x16xf32, #tpu.memory_space<vmem>>, vector<8x16xf32>
    %cst_26 = arith.constant dense<0.000000e+00> : vector<8x32xf32>
    %55 = tpu.matmul %54, %49, %cst_26 {dimension_numbers = #tpu.dot_dimension_numbers<[1], [0], [0], [1], [0, 0, 1, 1], [], []>} : vector<8x16xf32>, vector<16x32xf32>, vector<8x32xf32> -> vector<8x32xf32>
    %c0_27 = arith.constant 0 : index
    %c0_28 = arith.constant 0 : index
    %56 = vector.load %arg10[%c0_27, %c0_28] : memref<2x32xf32, #tpu.memory_space<vmem>>, vector<1x32xf32>
    %c1 = arith.constant 1 : index
    %c0_29 = arith.constant 0 : index
    %57 = vector.load %arg10[%c1, %c0_29] : memref<2x32xf32, #tpu.memory_space<vmem>>, vector<1x32xf32>
    %c1_i32_30 = arith.constant 1 : i32
    %58 = tpu.dynamic_rotate %51 by %c1_i32_30 dim 1 : vector<8x32xf32>, i32 -> vector<8x32xf32>
    %59 = vector.broadcast %56 : vector<1x32xf32> to vector<8x32xf32>
    %60 = arith.mulf %59, %58 : vector<8x32xf32>
    %61 = arith.addf %53, %60 : vector<8x32xf32>
    %c31_i32 = arith.constant 31 : i32
    %62 = tpu.dynamic_rotate %55 by %c31_i32 dim 1 : vector<8x32xf32>, i32 -> vector<8x32xf32>
    %63 = vector.broadcast %57 : vector<1x32xf32> to vector<8x32xf32>
    %64 = arith.mulf %63, %62 : vector<8x32xf32>
    %65 = arith.addf %61, %64 : vector<8x32xf32>
    %c0_31 = arith.constant 0 : index
    %c0_32 = arith.constant 0 : index
    %66 = vector.load %arg11[%c0_31, %c0_32] : memref<8x32xf32, #tpu.memory_space<vmem>>, vector<8x32xf32>
    tpu.vector_store %arg11[%c0_31, %c0_32], %65 {strides = array<i32>} : memref<8x32xf32, #tpu.memory_space<vmem>>, vector<8x32xf32>,
    return
  }
  func.func @transform_0(%arg0: i32) -> (i32, i32) {
    %c0_i32 = arith.constant 0 : i32
    %c0_i32_0 = arith.constant 0 : i32
    return %c0_i32, %arg0 : i32, i32
  }
  func.func @transform_1(%arg0: i32) -> (i32, i32) {
    %c0_i32 = arith.constant 0 : i32
    %c0_i32_0 = arith.constant 0 : i32
    return %c0_i32, %arg0 : i32, i32
  }
  func.func @transform_2(%arg0: i32) -> (i32, i32) {
    %c0_i32 = arith.constant 0 : i32
    %c0_i32_0 = arith.constant 0 : i32
    %c0_i32_1 = arith.constant 0 : i32
    return %c0_i32, %c0_i32_0 : i32, i32
  }
  func.func @transform_3(%arg0: i32) -> (i32, i32) {
    %c0_i32 = arith.constant 0 : i32
    %c0_i32_0 = arith.constant 0 : i32
    %c0_i32_1 = arith.constant 0 : i32
    return %c0_i32, %c0_i32_0 : i32, i32
  }
  func.func @transform_4(%arg0: i32) -> (i32, i32) {
    %c0_i32 = arith.constant 0 : i32
    %c0_i32_0 = arith.constant 0 : i32
    %c0_i32_1 = arith.constant 0 : i32
    return %c0_i32, %c0_i32_0 : i32, i32
  }
  func.func @transform_5(%arg0: i32) -> (i32, i32) {
    %c0_i32 = arith.constant 0 : i32
    %c0_i32_0 = arith.constant 0 : i32
    %c0_i32_1 = arith.constant 0 : i32
    return %c0_i32, %c0_i32_0 : i32, i32
  }
  func.func @transform_6(%arg0: i32) -> (i32, i32) {
    %c0_i32 = arith.constant 0 : i32
    %c0_i32_0 = arith.constant 0 : i32
    %c0_i32_1 = arith.constant 0 : i32
    return %c0_i32, %c0_i32_0 : i32, i32
  }
  func.func @transform_7(%arg0: i32) -> (i32, i32) {
    %c0_i32 = arith.constant 0 : i32
    %c0_i32_0 = arith.constant 0 : i32
    %c0_i32_1 = arith.constant 0 : i32
    return %c0_i32, %c0_i32_0 : i32, i32
  }
  func.func @transform_8(%arg0: i32) -> (i32, i32) {
    %c0_i32 = arith.constant 0 : i32
    %c0_i32_0 = arith.constant 0 : i32
    %c0_i32_1 = arith.constant 0 : i32
    return %c0_i32, %c0_i32_0 : i32, i32
  }
  func.func @transform_9(%arg0: i32) -> (i32, i32) {
    %c0_i32 = arith.constant 0 : i32
    %c0_i32_0 = arith.constant 0 : i32
    %c0_i32_1 = arith.constant 0 : i32
    return %c0_i32, %c0_i32_0 : i32, i32
  }
  func.func @transform_10(%arg0: i32) -> (i32, i32) {
    %c0_i32 = arith.constant 0 : i32
    %c0_i32_0 = arith.constant 0 : i32
    return %c0_i32, %arg0 : i32, i32
  }
}

</mosaic_0001>

<bundles_post_ra>
// kernel: tpu_custom_call.1
= control target key start
LH: loop header
LB: loop body
LE: loop exit
PB: predicated region body
PF: predicated region fallthrough
CT: control target
= control target key end

     0   :  { %15 = vsyncpa [#allocation3], 0  ;;  %s524_s0 = inlined_call_operand.vmem [shape: f32[8,32], index: 0, kind: input, shape index: {}]   ;;  %s525_s1 = inlined_call_operand.vmem [shape: f32[8,32], index: 1, kind: input, shape index: {}]   ;;  %s526_s2 = inlined_call_operand.vmem [shape: f32[8,8], index: 2, kind: input, shape index: {}]   ;;  %s527_s3 = inlined_call_operand.vmem [shape: f32[8,1], index: 3, kind: input, shape index: {}]   ;;  %s528_s4 = inlined_call_operand.vmem [shape: f32[16,8], index: 4, kind: input, shape index: {}]   ;;  %s529_s5 = inlined_call_operand.vmem [shape: f32[16,1], index: 5, kind: input, shape index: {}]   ;;  %s530_s6 = inlined_call_operand.vmem [shape: f32[8,16], index: 6, kind: input, shape index: {}]   ;;  %s531_s7 = inlined_call_operand.vmem [shape: f32[8,16], index: 7, kind: input, shape index: {}]   ;;  %s532_s8 = inlined_call_operand.vmem [shape: f32[8,16], index: 8, kind: input, shape index: {}]   ;;  %s533_s9 = inlined_call_operand.hbm [shape: f32[2,32], index: 9, kind: input, shape index: {}]   ;;  %s534_s10 = inlined_call_operand.hbm [shape: f32[8,32], index: 10, kind: output, shape index: {}]  }
   0x1   :  { %16 = vsyncpa [#allocation4], 0  ;;  %s40_s15 = sshll.u32 %s533_s9, 4  ;;  %s383_s16 = smov [#allocation2]   ;;  %s41_s15 = int_to_ptr.hbm [resolvable:$true] %s40_s15 }
   0x2   :  { %s42_s17 = sshll.u32 %s383_s16, 4  ;;  %s43_s17 = int_to_ptr.vmem [resolvable:$true] %s42_s17 }
   0x3   :  { %45 = dma.hbm_to_vmem [thread:$0]  %s41_s15, 32, %s43_s17, [#allocation3]  }
   0x4   :  { %379 = dma.done.wait [#allocation3], 32  }
   0x5   :  { %380 = vsyncadd [#allocation3], 4294967264  ;;  %v384_v0 = vmov 0   ;;  %vm58_vm0 = vcmask 64512   ;;  %v51_v1 = vld [vmem:[%s524_s0] sm:$0xff]  ;;  %v83_v7 = vld [vmem:[%s528_s4 + $0x8] sm:$0xff]  ;;  %v131_v13 = vlaneseq }
   0x6   :  { %327 = vset.pattern.permute.xlu0 %v384_v0  ;;  %328 = vset.pattern.permute.xlu1 %v384_v0  ;;  %v84_v2 = vld [vmem:[%s525_s1] sm:$0xff]  ;;  %v86_v8 = vld [vmem:[%s529_s5 + $0x8] sm:$0xff]  ;;  %vm196_vm2 = vcmask 130048   ;;  %s385_s11 = smov 32   ;;  %vm247_vm3 = vcmask 1047808   ;;  %s305_s17 = sshll.u32 %s534_s10, 4  ;;  %s306_s17 = int_to_ptr.hbm [resolvable:$true] %s305_s17 }
   0x7   :  { %v50_v3 = vld [vmem:[%s526_s2] sm:$0xff]  ;;  %77 = vmatpush.msra.mxu0 %v51_v1  ;;  %118 = vmatpush.msra.mxu1 %v84_v2  ;;  %v473_v15 = vshrl.u32 %v131_v13, 7  ;;  %vm296_vm4 = vcmask 261120  }
   0x8   :  { %v82_v4 = vld [vmem:[%s528_s4] sm:$0xff]  ;;  %315 = vmatmul.msk.f32.vlgmr.msra.gmra.mxu0 %vm58_vm0, %v50_v3 }
   0x9   :  { %v85_v5 = vld [vmem:[%s529_s5] sm:$0xff]  ;;  %316 = vmatmul.msk.f32.vlgmr.msra.gmra.mxu1 %vm58_vm0, %v82_v4  ;;  %vm133_vm1 = vcmp.lt.s32.totalorder %v473_v15, 1 }
   0xa   :  { %v52_v6 = vld [vmem:[%s527_s3] sm:$0xff]  ;;  %89 = vperm.xlu0 %327, %v85_v5  }
   0xb   :  { %55 = vperm.xlu1 %328, %v52_v6  }
  0x11   :  { %317 = vmatmul.msk.f32.gmra.mxu1 %vm58_vm0, %v83_v7 }
  0x12   :  { %94 = vperm.xlu0 %327, %v86_v8  }
  0x7c   :  { %v90_v9 = vpop.permute.xlu0 %89 }
  0x7d   :  { %v56_v11 = vpop.permute.xlu1 %55 }
  0x84   :  { %v95_v17 = vpop.permute.xlu0 %94 }
  0x85   :  { %v79_v12 = vpop.f32.mrf.mxu0 }
  0x86   :  { %v120_v10 = vpop.f32.mrf.mxu1  ;;  %v471_v14 = vadd.f32 %v79_v12, %v56_v11 }
  0x87   :  { %v121_v16 = vadd.f32 %v120_v10, %v90_v9 }
  0x88   :  { %v126_v20 = vperm.slane %v471_v14, 0  ;;  %v136_v21 = vperm.slane %v471_v14, 1  ;;  %v145_v24 = vperm.slane %v471_v14, 2  ;;  %v154_v33 = vperm.slane %v471_v14, 3 }
  0x89   :  { %v129_v22 = vrot.slane %v121_v16, 7  ;;  %v163_v50 = vperm.slane %v471_v14, 4  ;;  %v172_v59 = vperm.slane %v471_v14, 5  ;;  %v181_v4 = vperm.slane %v471_v14, 6 }
  0x8a   :  { %v127_v25 = vmul.f32 %v126_v20, %v121_v16  ;;  %v190_v13 = vperm.slane %v471_v14, 7  ;;  %v221_v14 = vld [vmem:[%s532_s8] sm:$0xff]  ;;  %s387_s8 = smov 127  }
  0x8e   :  { %v123_v18 = vpop.f32.mrf.mxu1 }
  0x8f   :  { %v124_v19 = vadd.f32 %v123_v18, %v95_v17 }
  0x91   :  { %v130_v23 = vrot.slane %v124_v19, 7  ;;  %v128_v26 = vmul.f32 %v126_v20, %v124_v19 }
  0x93   :  { %v134_v27 = vsel %vm133_vm1, %v129_v22, %v130_v23  ;;  %v135_v28 = vsel %vm133_vm1, %v130_v23, %v129_v22 }
  0x94   :  { %v137_v29 = vmul.f32 %v136_v21, %v135_v28  ;;  %v138_v30 = vmul.f32 %v136_v21, %v134_v27  ;;  %v141_v31 = vrot.slane %v135_v28, 7  ;;  %v142_v32 = vrot.slane %v134_v27, 7 }
  0x96   :  { %v139_v34 = vadd.f32 %v137_v29, %v127_v25  ;;  %v140_v35 = vadd.f32 %v138_v30, %v128_v26  ;;  %v143_v36 = vsel %vm133_vm1, %v141_v31, %v142_v32  ;;  %v144_v37 = vsel %vm133_vm1, %v142_v32, %v141_v31  ;;  %v220_v26 = vld [vmem:[%s531_s7] sm:$0xff]  ;;  %s388_s7 = smov [#allocation5]  }
  0x97   :  { %v146_v38 = vmul.f32 %v145_v24, %v144_v37  ;;  %v147_v39 = vmul.f32 %v145_v24, %v143_v36  ;;  %v150_v40 = vrot.slane %v144_v37, 7  ;;  %v151_v41 = vrot.slane %v143_v36, 7  ;;  %v195_v24 = vld [vmem:[%s530_s6] sm:$0xff]  ;;  %s386_s6 = smov 97   ;;  %s303_s14 = sshll.u32 %s388_s7, 4  ;;  %s304_s14 = int_to_ptr.vmem [resolvable:$true] %s303_s14 }
  0x98   :  { %v329_v36 = vld [vmem:[#allocation2 + $0x1] ss:$0 sm:$0xff] }
  0x99   :  { %v148_v42 = vadd.f32 %v146_v38, %v139_v34  ;;  %v149_v43 = vadd.f32 %v147_v39, %v140_v35  ;;  %v152_v44 = vsel %vm133_vm1, %v150_v40, %v151_v41  ;;  %v153_v45 = vsel %vm133_vm1, %v151_v41, %v150_v40  ;;  %v330_v35 = vld [vmem:[#allocation2] ss:$0 sm:$0xff] }
  0x9a   :  { %v156_v46 = vmul.f32 %v154_v33, %v152_v44  ;;  %v159_v47 = vrot.slane %v153_v45, 7  ;;  %v160_v48 = vrot.slane %v152_v44, 7  ;;  %v155_v49 = vmul.f32 %v154_v33, %v153_v45 }
  0x9c   :  { %v158_v51 = vadd.f32 %v156_v46, %v149_v43  ;;  %v161_v52 = vsel %vm133_vm1, %v159_v47, %v160_v48  ;;  %v162_v53 = vsel %vm133_vm1, %v160_v48, %v159_v47  ;;  %v157_v54 = vadd.f32 %v155_v49, %v148_v42 }
  0x9d   :  { %v165_v55 = vmul.f32 %v163_v50, %v161_v52  ;;  %v168_v56 = vrot.slane %v162_v53, 7  ;;  %v169_v57 = vrot.slane %v161_v52, 7  ;;  %v164_v58 = vmul.f32 %v163_v50, %v162_v53 }
  0x9f   :  { %v167_v60 = vadd.f32 %v165_v55, %v158_v51  ;;  %v170_v61 = vsel %vm133_vm1, %v168_v56, %v169_v57  ;;  %v171_v62 = vsel %vm133_vm1, %v169_v57, %v168_v56  ;;  %v166_v63 = vadd.f32 %v164_v58, %v157_v54 }
  0xa0   :  { %v174_v0 = vmul.f32 %v172_v59, %v170_v61  ;;  %v177_v1 = vrot.slane %v171_v62, 7  ;;  %v178_v2 = vrot.slane %v170_v61, 7  ;;  %v173_v3 = vmul.f32 %v172_v59, %v171_v62 }
  0xa2   :  { %v176_v5 = vadd.f32 %v174_v0, %v167_v60  ;;  %v179_v6 = vsel %vm133_vm1, %v177_v1, %v178_v2  ;;  %v180_v7 = vsel %vm133_vm1, %v178_v2, %v177_v1  ;;  %v175_v8 = vadd.f32 %v173_v3, %v166_v63 }
  0xa3   :  { %v183_v9 = vmul.f32 %v181_v4, %v179_v6  ;;  %v186_v10 = vrot.slane %v180_v7, 7  ;;  %v187_v11 = vrot.slane %v179_v6, 7  ;;  %v182_v12 = vmul.f32 %v181_v4, %v180_v7 }
  0xa5   :  { %v185_v16 = vadd.f32 %v183_v9, %v176_v5  ;;  %v188_v17 = vsel %vm133_vm1, %v186_v10, %v187_v11  ;;  %v189_v18 = vsel %vm133_vm1, %v187_v11, %v186_v10  ;;  %v184_v20 = vadd.f32 %v182_v12, %v175_v8 }
  0xa6   :  { %v192_v19 = vmul.f32 %v190_v13, %v188_v17  ;;  %v191_v21 = vmul.f32 %v190_v13, %v189_v18 }
  0xa8   :  { %v194_v22 = vadd.f32 %v192_v19, %v185_v16  ;;  %v193_v23 = vadd.f32 %v191_v21, %v184_v20 }
  0xaa   :  { %214 = vmatpush.msra.mxu2 %v194_v22  ;;  %239 = vmatpush.msra.mxu3 %v194_v22 }
  0xab   :  { %277 = vmatpush.msrb.mxu0 %v194_v22 }
  0xac   :  { %215 = vmatpush.msra.mxu2 %v193_v23  ;;  %240 = vmatpush.msra.mxu3 %v193_v23 }
  0xad   :  { %278 = vmatpush.msrb.mxu0 %v193_v23  ;;  %318 = vmatmul.msk.f32.vlgmr.msra.gmra.mxu2 %vm196_vm2, %v195_v24 }
  0xae   :  { %319 = vmatmul.msk.f32.vlgmr.msra.gmra.mxu3 %vm196_vm2, %v221_v14  ;;  %320 = vmatmul.msk.f32.vlgmr.msrb.gmra.mxu0 %vm196_vm2, %v220_v26 }
 0x12b   :  { %v280_v37 = vpop.f32.mrf.mxu0 }
 0x130   :  { %v217_v15 = vpop.f32.mrf.mxu2 }
 0x131   :  { %v242_v25 = vpop.f32.mrf.mxu3  ;;  %248 = vrot.lane.b32.xlu1 %v217_v15, %s385_s11 }
 0x132   :  { %283 = vrot.lane.b32.xlu2 %v242_v25, %s385_s11 }
 0x18c   :  { %v284_v27 = vpop.permute.xlu2 %283 }
 0x18d   :  { %v285_v28 = vsel %vm247_vm3, %v284_v27, %v242_v25 }
 0x18e   :  { %286 = vrot.lane.b32.xlu0 %v285_v28, %s385_s11 }
 0x1a3   :  { %v249_v29 = vpop.permute.xlu1 %248 }
 0x1a4   :  { %v250_v30 = vsel %vm247_vm3, %v249_v29, %v217_v15 }
 0x1a5   :  { %251 = vrot.lane.b32.xlu2 %v250_v30, %s385_s11 }
 0x1ff   :  { %v252_v31 = vpop.permute.xlu2 %251 }
 0x200   :  { %v287_v32 = vpop.permute.xlu0 %286  ;;  %v253_v33 = vsel %vm247_vm3, %v252_v31, %v217_v15 }
 0x201   :  { %v288_v34 = vsel %vm247_vm3, %v287_v32, %v242_v25  ;;  %256 = vrot.lane.b32.xlu1 %v253_v33, %s386_s6 }
 0x202   :  { %291 = vrot.lane.b32.xlu2 %v288_v34, %s387_s8 }
 0x25c   :  { %v292_v38 = vpop.permute.xlu2 %291 }
 0x25d   :  { %v294_v41 = vmul.f32 %v329_v36, %v292_v38 }
 0x273   :  { %v257_v39 = vpop.permute.xlu1 %256 }
 0x274   :  { %v259_v40 = vmul.f32 %v330_v35, %v257_v39 }
 0x276   :  { %v281_v42 = vadd.f32 %v280_v37, %v259_v40 }
 0x278   :  { %v295_v43 = vadd.f32 %v294_v41, %v281_v42 }
 0x27a   :  { %297 = vst.msk [vmem:[#allocation5] sm:$0xff] %vm296_vm4, %v295_v43 }
 0x27b   :  { %308 = dma.vmem_to_hbm [thread:$0]  %s304_s14, 128, %s306_s17, [#allocation4]  }
 0x27c   :  { %381 = dma.done.wait [#allocation4], 128  }
 0x27d   :  { %382 = vsyncadd [#allocation4], 4294967168 }
 0x27e   :  { %313 = vsyncpa [#allocation3], 1 }
 0x27f   :  { %314 = vsyncpa [#allocation4], 1 }

</bundles_post_ra>
